<compile_context>
chip_gen: v6e
topology: v6e:2x2x1
jax: 0.10.0
libtpu: 0.0.40
codegen_flags: <defaults>
</compile_context>

<pallas_src>
import numpy as np
import jax
import jax.numpy as jnp
from jax.experimental import pallas as pl
from jax.experimental.pallas import tpu as pltpu

MAX_K = 8          # largest conv-bank kernel size
PAD = MAX_K // 2   # reflect padding applied once to the raw input (covers all k)


def _leaky(v):
    return jnp.where(v > 0, v, 0.01 * v)   # nn.LeakyReLU() default slope


def _dot(a, b):
    # Default (bf16-input) MXU precision per the perf review; verified against
    # the f32 NumPy reference at 2e-2 tolerance below.
    return jnp.dot(a, b, preferred_element_type=jnp.float32)


# ----------------------------------------------------------------------------
# Pallas kernel: conv bank -> conv2(s2) -> BN16 -> act -> pool(4)
#                -> conv3(s2) -> BN8 -> act -> pool(4)
# Batch is packed along the lane axis; one invocation, no grid.
# ----------------------------------------------------------------------------
def audio_encoder_kernel(xgp_ref, wall_ref, ball_ref, w2b_ref, w2r_ref,
                         d2a_ref, d2b_ref, b2_ref, g16_ref, be16_ref,
                         w3s_ref, d3a_ref, d3b_ref, b3_ref, g8_ref, be8_ref,
                         out_ref, xwin_scr, h2_scr):
    N = out_ref.shape[1]
    NLp = xwin_scr.shape[1]              # N * (L + 2*PAD), padded-block layout
    NT2 = d2a_ref.shape[1]               # N * T2
    T3 = d3a_ref.shape[1] // N           # final conv length per batch element

    # ---- stage 1: conv bank for the whole batch at once --------------------
    # Stage the 8 shifted views of the packed padded signal once (8 row stores
    # + one load total, instead of 8 stores + reload per batch element
    # interleaved with the matmuls as in v1).
    for s in range(MAX_K):
        xwin_scr[s:s + 1, :] = xgp_ref[:, s:s + NLp]
    xwin = xwin_scr[...]                                     # (8, N*Lp)
    raw = xgp_ref[:, PAD:PAD + NLp]                          # (1, N*Lp) raw channel

    bank = _leaky(_dot(wall_ref[...], xwin) + ball_ref[...])  # (32, N*Lp)

    # ---- conv2 (k=2, stride 2, reflect pad) --------------------------------
    # Stacked [w2[:,:,0]; w2[:,:,1]] applied once; raw input channel enters as
    # a rank-1 VPU term (no 33-row concat); the two 0/1 tap selections (with
    # the reflect pad baked in) pick the strided columns for the whole batch.
    B = _dot(w2b_ref[...], bank) + w2r_ref[...] * raw          # (32, N*Lp)
    out2 = (_dot(B[:16, :], d2a_ref[...]) +
            _dot(B[16:, :], d2b_ref[...]) + b2_ref[...])       # (16, N*T2)

    # ---- BatchNorm1d(16): training-mode biased stats over (N, T2) ----------
    mean2 = jnp.mean(out2, axis=1, keepdims=True)
    var2 = jnp.mean(jnp.square(out2 - mean2), axis=1, keepdims=True)  # >= 0
    h2 = _leaky((out2 - mean2) * jax.lax.rsqrt(var2 + 1e-5)
                * g16_ref[...] + be16_ref[...])                # (16, N*T2)

    # ---- MaxPool1d(4): running max of 4 shifted windows (no matmuls) -------
    # Only columns with (col % 4 == 0) are consumed downstream, so overlap of
    # the shifted reads across batch blocks is harmless; tail is zeroed so no
    # uninitialized values can reach the later contractions.
    h2_scr[:, NT2:NT2 + 4] = jnp.zeros((h2_scr.shape[0], 4), jnp.float32)
    h2_scr[:, 0:NT2] = h2
    m = h2
    for k in range(1, 4):
        m = jnp.maximum(m, h2_scr[:, k:k + NT2])               # (16, N*T2)

    # ---- conv3 (k=2, stride 2, reflect pad) on the pooled columns ----------
    M = _dot(w3s_ref[...], m)                                  # (16, N*T2)
    out3 = (_dot(M[:8, :], d3a_ref[...]) +
            _dot(M[8:, :], d3b_ref[...]) + b3_ref[...])        # (8, N*T3)

    # ---- BatchNorm1d(8) + act ----------------------------------------------
    mean3 = jnp.mean(out3, axis=1, keepdims=True)
    var3 = jnp.mean(jnp.square(out3 - mean3), axis=1, keepdims=True)
    h3 = _leaky((out3 - mean3) * jax.lax.rsqrt(var3 + 1e-5)
                * g8_ref[...] + be8_ref[...])                  # (8, N*T3)

    # ---- final MaxPool1d(4): T3 == 4 -> one max per (channel, batch) -------
    for n in range(N):
        out_ref[:, n:n + 1] = jnp.max(h3[:, n * T3:(n + 1) * T3],
                                      axis=1, keepdims=True)


# ----------------------------------------------------------------------------
# Parameter init (deterministic, PyTorch-style uniform bounds)
# ----------------------------------------------------------------------------
def init_params(key):
    ks = jax.random.split(key, 20)
    bank_w, bank_b = [], []
    for k in range(1, MAX_K + 1):
        bound = 1.0 / np.sqrt(1 * k)
        bank_w.append(jax.random.uniform(ks[2 * (k - 1)], (4, 1, k), jnp.float32, -bound, bound))
        bank_b.append(jax.random.uniform(ks[2 * (k - 1) + 1], (4,), jnp.float32, -bound, bound))
    bound2 = 1.0 / np.sqrt(33 * 2)
    bound3 = 1.0 / np.sqrt(16 * 2)
    return {
        'bank_w': bank_w, 'bank_b': bank_b,
        'w2': jax.random.uniform(ks[16], (16, 33, 2), jnp.float32, -bound2, bound2),
        'b2': jax.random.uniform(ks[17], (16,), jnp.float32, -bound2, bound2),
        'w3': jax.random.uniform(ks[18], (8, 16, 2), jnp.float32, -bound3, bound3),
        'b3': jax.random.uniform(ks[19], (8,), jnp.float32, -bound3, bound3),
        'g16': jnp.ones((16,), jnp.float32), 'be16': jnp.zeros((16,), jnp.float32),
        'g8': jnp.ones((8,), jnp.float32), 'be8': jnp.zeros((8,), jnp.float32),
    }


# ----------------------------------------------------------------------------
# Host-side packing: fused conv-bank weights, stacked conv weights and the 0/1
# tap-selection matrices for the batch-packed layout.  Built ONCE per (N, L).
# ----------------------------------------------------------------------------
def pack_params(params, N, L):
    Lp = L + 2 * PAD
    T2 = L // 2
    L3 = T2 // 4
    T3 = L3 // 2
    NT2 = N * T2
    NT3 = N * T3

    bank_w = [np.asarray(w) for w in params['bank_w']]
    bank_b = [np.asarray(b) for b in params['bank_b']]

    # All 8 conv-bank kernels aligned against a single (8, .) shifted-window
    # matrix built from the input reflect-padded by PAD on each side.
    wall = np.zeros((32, MAX_K), np.float32)
    ball = np.zeros((32, 1), np.float32)
    for k in range(1, MAX_K + 1):
        off = PAD - k // 2
        wall[4 * (k - 1):4 * k, off:off + k] = bank_w[k - 1][:, 0, :]
        ball[4 * (k - 1):4 * k, 0] = bank_b[k - 1]

    w2 = np.asarray(params['w2'])            # (16, 33, 2)
    w3 = np.asarray(params['w3'])            # (8, 16, 2)
    w2s = np.concatenate([w2[:, :, 0], w2[:, :, 1]], axis=0).astype(np.float32)  # (32, 33)
    w3s = np.concatenate([w3[:, :, 0], w3[:, :, 1]], axis=0).astype(np.float32)  # (16, 16)

    # conv2 tap selections on the batch-packed *padded* layout (N*Lp columns).
    # tap j=0 reads position 2t-1 (reflect -> position 1 at t=0), tap j=1 reads 2t.
    d2a = np.zeros((N * Lp, NT2), np.float32)
    d2b = np.zeros((N * Lp, NT2), np.float32)
    for n in range(N):
        for t in range(T2):
            p0 = 2 * t - 1 if t >= 1 else 1
            d2a[n * Lp + p0, n * T2 + t] = 1.0
            d2b[n * Lp + 2 * t, n * T2 + t] = 1.0

    # conv3 tap selections: pooled value i of batch n lives at column n*T2 + 4*i
    # of the rolling-max array.
    d3a = np.zeros((NT2, NT3), np.float32)
    d3b = np.zeros((NT2, NT3), np.float32)
    for n in range(N):
        for t in range(T3):
            q0 = 2 * t - 1 if t >= 1 else 1
            d3a[n * T2 + 4 * q0, n * T3 + t] = 1.0
            d3b[n * T2 + 4 * (2 * t), n * T3 + t] = 1.0

    packed = dict(
        wall=wall, ball=ball,
        w2b=np.ascontiguousarray(w2s[:, :32]), w2r=np.ascontiguousarray(w2s[:, 32:33]),
        d2a=d2a, d2b=d2b,
        b2=np.asarray(params['b2']).reshape(16, 1).astype(np.float32),
        g16=np.asarray(params['g16']).reshape(16, 1).astype(np.float32),
        be16=np.asarray(params['be16']).reshape(16, 1).astype(np.float32),
        w3s=w3s, d3a=d3a, d3b=d3b,
        b3=np.asarray(params['b3']).reshape(8, 1).astype(np.float32),
        g8=np.asarray(params['g8']).reshape(8, 1).astype(np.float32),
        be8=np.asarray(params['be8']).reshape(8, 1).astype(np.float32),
    )
    return {k: jnp.asarray(v) for k, v in packed.items()}


# ----------------------------------------------------------------------------
# Jitted wrapper: reflect pad + batch packing (layout plumbing only), then one
# pallas_call for the whole forward pass.
# ----------------------------------------------------------------------------
@jax.jit
def audio_encoder_forward(x, pk):
    N, C, L = x.shape
    assert C == 1, "AudioEncoder expects a single input channel"
    assert L % 16 == 0 and L > 2 * PAD
    assert L // 16 == 4, "final MaxPool1d(4) stage specialized to L == 64"
    Lp = L + 2 * PAD
    NT2 = N * (L // 2)

    xg = jnp.pad(x.astype(jnp.float32), ((0, 0), (0, 0), (PAD, PAD)), mode='reflect')
    # batch packed along the lane axis (padded-block layout) + MAX_K zero tail
    xgp = jnp.pad(xg.reshape(1, N * Lp), ((0, 0), (0, MAX_K)))

    args = (xgp, pk['wall'], pk['ball'], pk['w2b'], pk['w2r'],
            pk['d2a'], pk['d2b'], pk['b2'], pk['g16'], pk['be16'],
            pk['w3s'], pk['d3a'], pk['d3b'], pk['b3'], pk['g8'], pk['be8'])

    vmem = pl.BlockSpec(memory_space=pltpu.MemorySpace.VMEM)
    out = pl.pallas_call(
        audio_encoder_kernel,
        out_shape=jax.ShapeDtypeStruct((8, N), jnp.float32),
        in_specs=[vmem] * len(args),
        out_specs=vmem,
        scratch_shapes=[
            pltpu.VMEM((MAX_K, N * Lp), jnp.float32),   # shifted-window staging
            pltpu.VMEM((16, NT2 + 4), jnp.float32),     # maxpool shifted-read staging
        ],
    )(*args)
    return out.T   # (N, 8) == torch.flatten(out, start_dim=1)


# ----------------------------------------------------------------------------
# Pure NumPy reference of the PyTorch forward pass (for correctness check)
# ----------------------------------------------------------------------------
def reference_forward(x, p):
    def leaky(v): return np.where(v > 0, v, 0.01 * v)

    def rpad(a, l, r): return np.pad(a, ((0, 0), (0, 0), (l, r)), mode='reflect')

    def conv1d(a, w, b, stride=1):
        N, C, L = a.shape
        O, _, K = w.shape
        T = (L - K) // stride + 1
        out = np.zeros((N, O, T), np.float32)
        for t in range(T):
            seg = a[:, :, t * stride:t * stride + K]
            out[:, :, t] = np.einsum('nck,ock->no', seg, w) + b
        return out

    def bn(a, g, be, eps=1e-5):
        m = a.mean(axis=(0, 2), keepdims=True)
        v = a.var(axis=(0, 2), keepdims=True)
        return (a - m) / np.sqrt(v + eps) * g.reshape(1, -1, 1) + be.reshape(1, -1, 1)

    def maxpool(a, k):
        N, C, L = a.shape
        return a[:, :, :(L // k) * k].reshape(N, C, L // k, k).max(-1)

    outs = []
    for k in range(1, MAX_K + 1):
        l = k // 2
        r = k // 2 - 1 if k % 2 == 0 else k // 2
        outs.append(leaky(conv1d(rpad(x, l, r), p['bank_w'][k - 1], p['bank_b'][k - 1])))
    h = np.concatenate(outs + [x], axis=1)
    h = conv1d(rpad(h, 1, 0), p['w2'], p['b2'], stride=2)
    h = leaky(bn(h, p['g16'], p['be16']))
    h = maxpool(h, 4)
    h = conv1d(rpad(h, 1, 0), p['w3'], p['b3'], stride=2)
    h = leaky(bn(h, p['g8'], p['be8']))
    h = maxpool(h, 4)
    return h.reshape(h.shape[0], -1)


if __name__ == "__main__":
    key = jax.random.PRNGKey(0)
    k_param, k_x = jax.random.split(key)
    params = init_params(k_param)

    N, L = 2, 64
    x = jax.random.normal(k_x, (N, 1, L), jnp.float32)

    pk = pack_params(params, N, L)          # built once, outside the jitted forward
    out = jax.block_until_ready(audio_encoder_forward(x, pk))

    np_params = {
        'bank_w': [np.asarray(w) for w in params['bank_w']],
        'bank_b': [np.asarray(b) for b in params['bank_b']],
        'w2': np.asarray(params['w2']), 'b2': np.asarray(params['b2']),
        'w3': np.asarray(params['w3']), 'b3': np.asarray(params['b3']),
        'g16': np.asarray(params['g16']), 'be16': np.asarray(params['be16']),
        'g8': np.asarray(params['g8']), 'be8': np.asarray(params['be8']),
    }
    ref = reference_forward(np.asarray(x), np_params)
    assert out.shape == ref.shape == (N, 8)
    # default (bf16-input) MXU precision per the perf review -> 2e-2 tolerance
    np.testing.assert_allclose(np.asarray(out), ref, rtol=2e-2, atol=2e-2)
    print("KERNEL_OK")
</pallas_src>

<mosaic_0001>
module attributes {stable_mosaic.version = 11 : i64} {
  func.func @audio_encoder_kernel(%arg0: memref<1x152xf32, #tpu.memory_space<vmem>>, %arg1: memref<32x8xf32, #tpu.memory_space<vmem>>, %arg2: memref<32x1xf32, #tpu.memory_space<vmem>>, %arg3: memref<32x32xf32, #tpu.memory_space<vmem>>, %arg4: memref<32x1xf32, #tpu.memory_space<vmem>>, %arg5: memref<144x64xf32, #tpu.memory_space<vmem>>, %arg6: memref<144x64xf32, #tpu.memory_space<vmem>>, %arg7: memref<16x1xf32, #tpu.memory_space<vmem>>, %arg8: memref<16x1xf32, #tpu.memory_space<vmem>>, %arg9: memref<16x1xf32, #tpu.memory_space<vmem>>, %arg10: memref<16x16xf32, #tpu.memory_space<vmem>>, %arg11: memref<64x8xf32, #tpu.memory_space<vmem>>, %arg12: memref<64x8xf32, #tpu.memory_space<vmem>>, %arg13: memref<8x1xf32, #tpu.memory_space<vmem>>, %arg14: memref<8x1xf32, #tpu.memory_space<vmem>>, %arg15: memref<8x1xf32, #tpu.memory_space<vmem>>, %arg16: memref<8x2xf32, #tpu.memory_space<vmem>>, %arg17: memref<8x144xf32, #tpu.memory_space<vmem>>, %arg18: memref<16x68xf32, #tpu.memory_space<vmem>>) attributes {dimension_semantics = [], scalar_prefetch = 0 : i64, scratch_operands = 2 : i64, tpu.core_type = #tpu.core_type<tc>} {
    %c0 = arith.constant 0 : index
    %c0_0 = arith.constant 0 : index
    %0 = vector.load %arg0[%c0, %c0_0] : memref<1x152xf32, #tpu.memory_space<vmem>>, vector<1x144xf32>
    %c0_1 = arith.constant 0 : index
    %c0_2 = arith.constant 0 : index
    %1 = vector.load %arg17[%c0_1, %c0_2] : memref<8x144xf32, #tpu.memory_space<vmem>>, vector<1x144xf32>
    tpu.vector_store %arg17[%c0_1, %c0_2], %0 {strides = array<i32>} : memref<8x144xf32, #tpu.memory_space<vmem>>, vector<1x144xf32>,
    %c0_3 = arith.constant 0 : index
    %c1 = arith.constant 1 : index
    %2 = vector.load %arg0[%c0_3, %c1] : memref<1x152xf32, #tpu.memory_space<vmem>>, vector<1x144xf32>
    %c1_4 = arith.constant 1 : index
    %c0_5 = arith.constant 0 : index
    %3 = vector.load %arg17[%c1_4, %c0_5] : memref<8x144xf32, #tpu.memory_space<vmem>>, vector<1x144xf32>
    tpu.vector_store %arg17[%c1_4, %c0_5], %2 {strides = array<i32>} : memref<8x144xf32, #tpu.memory_space<vmem>>, vector<1x144xf32>,
    %c0_6 = arith.constant 0 : index
    %c2 = arith.constant 2 : index
    %4 = vector.load %arg0[%c0_6, %c2] : memref<1x152xf32, #tpu.memory_space<vmem>>, vector<1x144xf32>
    %c2_7 = arith.constant 2 : index
    %c0_8 = arith.constant 0 : index
    %5 = vector.load %arg17[%c2_7, %c0_8] : memref<8x144xf32, #tpu.memory_space<vmem>>, vector<1x144xf32>
    tpu.vector_store %arg17[%c2_7, %c0_8], %4 {strides = array<i32>} : memref<8x144xf32, #tpu.memory_space<vmem>>, vector<1x144xf32>,
    %c0_9 = arith.constant 0 : index
    %c3 = arith.constant 3 : index
    %6 = vector.load %arg0[%c0_9, %c3] : memref<1x152xf32, #tpu.memory_space<vmem>>, vector<1x144xf32>
    %c3_10 = arith.constant 3 : index
    %c0_11 = arith.constant 0 : index
    %7 = vector.load %arg17[%c3_10, %c0_11] : memref<8x144xf32, #tpu.memory_space<vmem>>, vector<1x144xf32>
    tpu.vector_store %arg17[%c3_10, %c0_11], %6 {strides = array<i32>} : memref<8x144xf32, #tpu.memory_space<vmem>>, vector<1x144xf32>,
    %c0_12 = arith.constant 0 : index
    %c4 = arith.constant 4 : index
    %8 = vector.load %arg0[%c0_12, %c4] : memref<1x152xf32, #tpu.memory_space<vmem>>, vector<1x144xf32>
    %c4_13 = arith.constant 4 : index
    %c0_14 = arith.constant 0 : index
    %9 = vector.load %arg17[%c4_13, %c0_14] : memref<8x144xf32, #tpu.memory_space<vmem>>, vector<1x144xf32>
    tpu.vector_store %arg17[%c4_13, %c0_14], %8 {strides = array<i32>} : memref<8x144xf32, #tpu.memory_space<vmem>>, vector<1x144xf32>,
    %c0_15 = arith.constant 0 : index
    %c5 = arith.constant 5 : index
    %10 = vector.load %arg0[%c0_15, %c5] : memref<1x152xf32, #tpu.memory_space<vmem>>, vector<1x144xf32>
    %c5_16 = arith.constant 5 : index
    %c0_17 = arith.constant 0 : index
    %11 = vector.load %arg17[%c5_16, %c0_17] : memref<8x144xf32, #tpu.memory_space<vmem>>, vector<1x144xf32>
    tpu.vector_store %arg17[%c5_16, %c0_17], %10 {strides = array<i32>} : memref<8x144xf32, #tpu.memory_space<vmem>>, vector<1x144xf32>,
    %c0_18 = arith.constant 0 : index
    %c6 = arith.constant 6 : index
    %12 = vector.load %arg0[%c0_18, %c6] : memref<1x152xf32, #tpu.memory_space<vmem>>, vector<1x144xf32>
    %c6_19 = arith.constant 6 : index
    %c0_20 = arith.constant 0 : index
    %13 = vector.load %arg17[%c6_19, %c0_20] : memref<8x144xf32, #tpu.memory_space<vmem>>, vector<1x144xf32>
    tpu.vector_store %arg17[%c6_19, %c0_20], %12 {strides = array<i32>} : memref<8x144xf32, #tpu.memory_space<vmem>>, vector<1x144xf32>,
    %c0_21 = arith.constant 0 : index
    %c7 = arith.constant 7 : index
    %14 = vector.load %arg0[%c0_21, %c7] : memref<1x152xf32, #tpu.memory_space<vmem>>, vector<1x144xf32>
    %c7_22 = arith.constant 7 : index
    %c0_23 = arith.constant 0 : index
    %15 = vector.load %arg17[%c7_22, %c0_23] : memref<8x144xf32, #tpu.memory_space<vmem>>, vector<1x144xf32>
    tpu.vector_store %arg17[%c7_22, %c0_23], %14 {strides = array<i32>} : memref<8x144xf32, #tpu.memory_space<vmem>>, vector<1x144xf32>,
    %c0_24 = arith.constant 0 : index
    %c0_25 = arith.constant 0 : index
    %16 = vector.load %arg17[%c0_24, %c0_25] : memref<8x144xf32, #tpu.memory_space<vmem>>, vector<8x144xf32>
    %c0_26 = arith.constant 0 : index
    %c4_27 = arith.constant 4 : index
    %17 = vector.load %arg0[%c0_26, %c4_27] : memref<1x152xf32, #tpu.memory_space<vmem>>, vector<1x144xf32>
    %c0_28 = arith.constant 0 : index
    %c0_29 = arith.constant 0 : index
    %18 = vector.load %arg1[%c0_28, %c0_29] : memref<32x8xf32, #tpu.memory_space<vmem>>, vector<32x8xf32>
    %cst = arith.constant dense<0.000000e+00> : vector<32x144xf32>
    %19 = tpu.matmul %18, %16, %cst {dimension_numbers = #tpu.dot_dimension_numbers<[1], [0], [0], [1], [0, 0, 1, 1], [], []>} : vector<32x8xf32>, vector<8x144xf32>, vector<32x144xf32> -> vector<32x144xf32>
    %c0_30 = arith.constant 0 : index
    %c0_31 = arith.constant 0 : index
    %20 = vector.load %arg2[%c0_30, %c0_31] : memref<32x1xf32, #tpu.memory_space<vmem>>, vector<32x1xf32>
    %21 = vector.broadcast %20 : vector<32x1xf32> to vector<32x144xf32>
    %22 = arith.addf %19, %21 : vector<32x144xf32>
    %cst_32 = arith.constant 0.000000e+00 : f32
    %23 = vector.broadcast %cst_32 : f32 to vector<32x144xf32>
    %24 = arith.cmpf ogt, %22, %23 : vector<32x144xf32>
    %cst_33 = arith.constant 0.00999999977 : f32
    %25 = vector.broadcast %cst_33 : f32 to vector<32x144xf32>
    %26 = arith.mulf %25, %22 : vector<32x144xf32>
    %27 = arith.select %24, %22, %26 : vector<32x144xi1>, vector<32x144xf32>
    %c0_34 = arith.constant 0 : index
    %c0_35 = arith.constant 0 : index
    %28 = vector.load %arg3[%c0_34, %c0_35] : memref<32x32xf32, #tpu.memory_space<vmem>>, vector<32x32xf32>
    %cst_36 = arith.constant dense<0.000000e+00> : vector<32x144xf32>
    %29 = tpu.matmul %28, %27, %cst_36 {dimension_numbers = #tpu.dot_dimension_numbers<[1], [0], [0], [1], [0, 0, 1, 1], [], []>} : vector<32x32xf32>, vector<32x144xf32>, vector<32x144xf32> -> vector<32x144xf32>
    %c0_37 = arith.constant 0 : index
    %c0_38 = arith.constant 0 : index
    %30 = vector.load %arg4[%c0_37, %c0_38] : memref<32x1xf32, #tpu.memory_space<vmem>>, vector<32x1xf32>
    %31 = vector.broadcast %30 : vector<32x1xf32> to vector<32x144xf32>
    %32 = vector.broadcast %17 : vector<1x144xf32> to vector<32x144xf32>
    %33 = arith.mulf %31, %32 : vector<32x144xf32>
    %34 = arith.addf %29, %33 : vector<32x144xf32>
    %35 = vector.extract_strided_slice %34 {offsets = [0, 0], sizes = [16, 144], strides = [1, 1]} : vector<32x144xf32> to vector<16x144xf32>
    %c0_39 = arith.constant 0 : index
    %c0_40 = arith.constant 0 : index
    %36 = vector.load %arg5[%c0_39, %c0_40] : memref<144x64xf32, #tpu.memory_space<vmem>>, vector<144x64xf32>
    %cst_41 = arith.constant dense<0.000000e+00> : vector<16x64xf32>
    %37 = tpu.matmul %35, %36, %cst_41 {dimension_numbers = #tpu.dot_dimension_numbers<[1], [0], [0], [1], [0, 0, 1, 1], [], []>} : vector<16x144xf32>, vector<144x64xf32>, vector<16x64xf32> -> vector<16x64xf32>
    %38 = vector.extract_strided_slice %34 {offsets = [16, 0], sizes = [16, 144], strides = [1, 1]} : vector<32x144xf32> to vector<16x144xf32>
    %c0_42 = arith.constant 0 : index
    %c0_43 = arith.constant 0 : index
    %39 = vector.load %arg6[%c0_42, %c0_43] : memref<144x64xf32, #tpu.memory_space<vmem>>, vector<144x64xf32>
    %cst_44 = arith.constant dense<0.000000e+00> : vector<16x64xf32>
    %40 = tpu.matmul %38, %39, %cst_44 {dimension_numbers = #tpu.dot_dimension_numbers<[1], [0], [0], [1], [0, 0, 1, 1], [], []>} : vector<16x144xf32>, vector<144x64xf32>, vector<16x64xf32> -> vector<16x64xf32>
    %41 = arith.addf %37, %40 : vector<16x64xf32>
    %c0_45 = arith.constant 0 : index
    %c0_46 = arith.constant 0 : index
    %42 = vector.load %arg7[%c0_45, %c0_46] : memref<16x1xf32, #tpu.memory_space<vmem>>, vector<16x1xf32>
    %43 = vector.broadcast %42 : vector<16x1xf32> to vector<16x64xf32>
    %44 = arith.addf %41, %43 : vector<16x64xf32>
    %cst_47 = arith.constant dense<0.000000e+00> : vector<16xf32>
    %45 = vector.multi_reduction <add>, %44, %cst_47 [1] : vector<16x64xf32> to vector<16xf32>
    %46 = vector.shape_cast %45 : vector<16xf32> to vector<16x1xf32>
    %cst_48 = arith.constant 6.400000e+01 : f32
    %47 = vector.broadcast %cst_48 : f32 to vector<16x1xf32>
    %48 = arith.divf %46, %47 : vector<16x1xf32>
    %49 = vector.broadcast %48 : vector<16x1xf32> to vector<16x64xf32>
    %50 = arith.subf %44, %49 : vector<16x64xf32>
    %51 = arith.mulf %50, %50 : vector<16x64xf32>
    %cst_49 = arith.constant dense<0.000000e+00> : vector<16xf32>
    %52 = vector.multi_reduction <add>, %51, %cst_49 [1] : vector<16x64xf32> to vector<16xf32>
    %53 = vector.shape_cast %52 : vector<16xf32> to vector<16x1xf32>
    %cst_50 = arith.constant 6.400000e+01 : f32
    %54 = vector.broadcast %cst_50 : f32 to vector<16x1xf32>
    %55 = arith.divf %53, %54 : vector<16x1xf32>
    %56 = vector.broadcast %48 : vector<16x1xf32> to vector<16x64xf32>
    %57 = arith.subf %44, %56 : vector<16x64xf32>
    %cst_51 = arith.constant 9.99999974E-6 : f32
    %58 = vector.broadcast %cst_51 : f32 to vector<16x1xf32>
    %59 = arith.addf %55, %58 : vector<16x1xf32>
    %60 = math.rsqrt %59 : vector<16x1xf32>
    %61 = vector.broadcast %60 : vector<16x1xf32> to vector<16x64xf32>
    %62 = arith.mulf %57, %61 : vector<16x64xf32>
    %c0_52 = arith.constant 0 : index
    %c0_53 = arith.constant 0 : index
    %63 = vector.load %arg8[%c0_52, %c0_53] : memref<16x1xf32, #tpu.memory_space<vmem>>, vector<16x1xf32>
    %64 = vector.broadcast %63 : vector<16x1xf32> to vector<16x64xf32>
    %65 = arith.mulf %62, %64 : vector<16x64xf32>
    %c0_54 = arith.constant 0 : index
    %c0_55 = arith.constant 0 : index
    %66 = vector.load %arg9[%c0_54, %c0_55] : memref<16x1xf32, #tpu.memory_space<vmem>>, vector<16x1xf32>
    %67 = vector.broadcast %66 : vector<16x1xf32> to vector<16x64xf32>
    %68 = arith.addf %65, %67 : vector<16x64xf32>
    %cst_56 = arith.constant 0.000000e+00 : f32
    %69 = vector.broadcast %cst_56 : f32 to vector<16x64xf32>
    %70 = arith.cmpf ogt, %68, %69 : vector<16x64xf32>
    %cst_57 = arith.constant 0.00999999977 : f32
    %71 = vector.broadcast %cst_57 : f32 to vector<16x64xf32>
    %72 = arith.mulf %71, %68 : vector<16x64xf32>
    %73 = arith.select %70, %68, %72 : vector<16x64xi1>, vector<16x64xf32>
    %cst_58 = arith.constant 0.000000e+00 : f32
    %74 = vector.broadcast %cst_58 : f32 to vector<16x4xf32>
    %c0_59 = arith.constant 0 : index
    %c64 = arith.constant 64 : index
    %75 = vector.load %arg18[%c0_59, %c64] : memref<16x68xf32, #tpu.memory_space<vmem>>, vector<16x4xf32>
    tpu.vector_store %arg18[%c0_59, %c64], %74 {strides = array<i32>} : memref<16x68xf32, #tpu.memory_space<vmem>>, vector<16x4xf32>,
    %c0_60 = arith.constant 0 : index
    %c0_61 = arith.constant 0 : index
    %76 = vector.load %arg18[%c0_60, %c0_61] : memref<16x68xf32, #tpu.memory_space<vmem>>, vector<16x64xf32>
    tpu.vector_store %arg18[%c0_60, %c0_61], %73 {strides = array<i32>} : memref<16x68xf32, #tpu.memory_space<vmem>>, vector<16x64xf32>,
    %c0_62 = arith.constant 0 : index
    %c1_63 = arith.constant 1 : index
    %77 = vector.load %arg18[%c0_62, %c1_63] : memref<16x68xf32, #tpu.memory_space<vmem>>, vector<16x64xf32>
    %78 = arith.maximumf %73, %77 : vector<16x64xf32>
    %c0_64 = arith.constant 0 : index
    %c2_65 = arith.constant 2 : index
    %79 = vector.load %arg18[%c0_64, %c2_65] : memref<16x68xf32, #tpu.memory_space<vmem>>, vector<16x64xf32>
    %80 = arith.maximumf %78, %79 : vector<16x64xf32>
    %c0_66 = arith.constant 0 : index
    %c3_67 = arith.constant 3 : index
    %81 = vector.load %arg18[%c0_66, %c3_67] : memref<16x68xf32, #tpu.memory_space<vmem>>, vector<16x64xf32>
    %82 = arith.maximumf %80, %81 : vector<16x64xf32>
    %c0_68 = arith.constant 0 : index
    %c0_69 = arith.constant 0 : index
    %83 = vector.load %arg10[%c0_68, %c0_69] : memref<16x16xf32, #tpu.memory_space<vmem>>, vector<16x16xf32>
    %cst_70 = arith.constant dense<0.000000e+00> : vector<16x64xf32>
    %84 = tpu.matmul %83, %82, %cst_70 {dimension_numbers = #tpu.dot_dimension_numbers<[1], [0], [0], [1], [0, 0, 1, 1], [], []>} : vector<16x16xf32>, vector<16x64xf32>, vector<16x64xf32> -> vector<16x64xf32>
    %85 = vector.extract_strided_slice %84 {offsets = [0, 0], sizes = [8, 64], strides = [1, 1]} : vector<16x64xf32> to vector<8x64xf32>
    %c0_71 = arith.constant 0 : index
    %c0_72 = arith.constant 0 : index
    %86 = vector.load %arg11[%c0_71, %c0_72] : memref<64x8xf32, #tpu.memory_space<vmem>>, vector<64x8xf32>
    %cst_73 = arith.constant dense<0.000000e+00> : vector<8x8xf32>
    %87 = tpu.matmul %85, %86, %cst_73 {dimension_numbers = #tpu.dot_dimension_numbers<[1], [0], [0], [1], [0, 0, 1, 1], [], []>} : vector<8x64xf32>, vector<64x8xf32>, vector<8x8xf32> -> vector<8x8xf32>
    %88 = vector.extract_strided_slice %84 {offsets = [8, 0], sizes = [8, 64], strides = [1, 1]} : vector<16x64xf32> to vector<8x64xf32>
    %c0_74 = arith.constant 0 : index
    %c0_75 = arith.constant 0 : index
    %89 = vector.load %arg12[%c0_74, %c0_75] : memref<64x8xf32, #tpu.memory_space<vmem>>, vector<64x8xf32>
    %cst_76 = arith.constant dense<0.000000e+00> : vector<8x8xf32>
    %90 = tpu.matmul %88, %89, %cst_76 {dimension_numbers = #tpu.dot_dimension_numbers<[1], [0], [0], [1], [0, 0, 1, 1], [], []>} : vector<8x64xf32>, vector<64x8xf32>, vector<8x8xf32> -> vector<8x8xf32>
    %91 = arith.addf %87, %90 : vector<8x8xf32>
    %c0_77 = arith.constant 0 : index
    %c0_78 = arith.constant 0 : index
    %92 = vector.load %arg13[%c0_77, %c0_78] : memref<8x1xf32, #tpu.memory_space<vmem>>, vector<8x1xf32>
    %93 = vector.broadcast %92 : vector<8x1xf32> to vector<8x8xf32>
    %94 = arith.addf %91, %93 : vector<8x8xf32>
    %cst_79 = arith.constant dense<0.000000e+00> : vector<8xf32>
    %95 = vector.multi_reduction <add>, %94, %cst_79 [1] : vector<8x8xf32> to vector<8xf32>
    %96 = vector.shape_cast %95 : vector<8xf32> to vector<8x1xf32>
    %cst_80 = arith.constant 8.000000e+00 : f32
    %97 = vector.broadcast %cst_80 : f32 to vector<8x1xf32>
    %98 = arith.divf %96, %97 : vector<8x1xf32>
    %99 = vector.broadcast %98 : vector<8x1xf32> to vector<8x8xf32>
    %100 = arith.subf %94, %99 : vector<8x8xf32>
    %101 = arith.mulf %100, %100 : vector<8x8xf32>
    %cst_81 = arith.constant dense<0.000000e+00> : vector<8xf32>
    %102 = vector.multi_reduction <add>, %101, %cst_81 [1] : vector<8x8xf32> to vector<8xf32>
    %103 = vector.shape_cast %102 : vector<8xf32> to vector<8x1xf32>
    %cst_82 = arith.constant 8.000000e+00 : f32
    %104 = vector.broadcast %cst_82 : f32 to vector<8x1xf32>
    %105 = arith.divf %103, %104 : vector<8x1xf32>
    %106 = vector.broadcast %98 : vector<8x1xf32> to vector<8x8xf32>
    %107 = arith.subf %94, %106 : vector<8x8xf32>
    %cst_83 = arith.constant 9.99999974E-6 : f32
    %108 = vector.broadcast %cst_83 : f32 to vector<8x1xf32>
    %109 = arith.addf %105, %108 : vector<8x1xf32>
    %110 = math.rsqrt %109 : vector<8x1xf32>
    %111 = vector.broadcast %110 : vector<8x1xf32> to vector<8x8xf32>
    %112 = arith.mulf %107, %111 : vector<8x8xf32>
    %c0_84 = arith.constant 0 : index
    %c0_85 = arith.constant 0 : index
    %113 = vector.load %arg14[%c0_84, %c0_85] : memref<8x1xf32, #tpu.memory_space<vmem>>, vector<8x1xf32>
    %114 = vector.broadcast %113 : vector<8x1xf32> to vector<8x8xf32>
    %115 = arith.mulf %112, %114 : vector<8x8xf32>
    %c0_86 = arith.constant 0 : index
    %c0_87 = arith.constant 0 : index
    %116 = vector.load %arg15[%c0_86, %c0_87] : memref<8x1xf32, #tpu.memory_space<vmem>>, vector<8x1xf32>
    %117 = vector.broadcast %116 : vector<8x1xf32> to vector<8x8xf32>
    %118 = arith.addf %115, %117 : vector<8x8xf32>
    %cst_88 = arith.constant 0.000000e+00 : f32
    %119 = vector.broadcast %cst_88 : f32 to vector<8x8xf32>
    %120 = arith.cmpf ogt, %118, %119 : vector<8x8xf32>
    %cst_89 = arith.constant 0.00999999977 : f32
    %121 = vector.broadcast %cst_89 : f32 to vector<8x8xf32>
    %122 = arith.mulf %121, %118 : vector<8x8xf32>
    %123 = arith.select %120, %118, %122 : vector<8x8xi1>, vector<8x8xf32>
    %124 = vector.extract_strided_slice %123 {offsets = [0, 0], sizes = [8, 4], strides = [1, 1]} : vector<8x8xf32> to vector<8x4xf32>
    %cst_90 = arith.constant dense<0xFF800000> : vector<8xf32>
    %125 = vector.multi_reduction <maximumf>, %124, %cst_90 [1] : vector<8x4xf32> to vector<8xf32>
    %126 = vector.shape_cast %125 : vector<8xf32> to vector<8x1xf32>
    %c0_91 = arith.constant 0 : index
    %c0_92 = arith.constant 0 : index
    %127 = vector.load %arg16[%c0_91, %c0_92] : memref<8x2xf32, #tpu.memory_space<vmem>>, vector<8x1xf32>
    tpu.vector_store %arg16[%c0_91, %c0_92], %126 {strides = array<i32>} : memref<8x2xf32, #tpu.memory_space<vmem>>, vector<8x1xf32>,
    %128 = vector.extract_strided_slice %123 {offsets = [0, 4], sizes = [8, 4], strides = [1, 1]} : vector<8x8xf32> to vector<8x4xf32>
    %cst_93 = arith.constant dense<0xFF800000> : vector<8xf32>
    %129 = vector.multi_reduction <maximumf>, %128, %cst_93 [1] : vector<8x4xf32> to vector<8xf32>
    %130 = vector.shape_cast %129 : vector<8xf32> to vector<8x1xf32>
    %c0_94 = arith.constant 0 : index
    %c1_95 = arith.constant 1 : index
    %131 = vector.load %arg16[%c0_94, %c1_95] : memref<8x2xf32, #tpu.memory_space<vmem>>, vector<8x1xf32>
    tpu.vector_store %arg16[%c0_94, %c1_95], %130 {strides = array<i32>} : memref<8x2xf32, #tpu.memory_space<vmem>>, vector<8x1xf32>,
    return
  }
}

</mosaic_0001>

<bundles_post_ra>
// kernel: audio_encoder_forward.1
= control target key start
LH: loop header
LB: loop body
LE: loop exit
PB: predicated region body
PF: predicated region fallthrough
CT: control target
= control target key end

     0   :  { %v1187_v2 = vmov 0   ;;  %s1188_s26 = smov 127   ;;  %s1189_s27 = smov 125   ;;  %v54_v5 = vlaneseq  ;;  %v1194_v12 = vmov 0.0   ;;  %vm65_vm1 = vcmask 1039360   ;;  %s1711_s0 = inlined_call_operand.vmem [shape: f32[1,152], index: 0, kind: input, shape index: {}]   ;;  %s1712_s2 = inlined_call_operand.vmem [shape: f32[32,1], index: 2, kind: input, shape index: {}]   ;;  %s1713_s4 = inlined_call_operand.vmem [shape: f32[32,1], index: 4, kind: input, shape index: {}]   ;;  %s1714_s1 = inlined_call_operand.vmem [shape: f32[32,8], index: 1, kind: input, shape index: {}]   ;;  %s1715_s7 = inlined_call_operand.vmem [shape: f32[16,1], index: 7, kind: input, shape index: {}]   ;;  %s1716_s6 = inlined_call_operand.vmem [shape: f32[144,64], index: 6, kind: input, shape index: {}]   ;;  %s1717_s3 = inlined_call_operand.vmem [shape: f32[32,32], index: 3, kind: input, shape index: {}]   ;;  %s1718_s5 = inlined_call_operand.vmem [shape: f32[144,64], index: 5, kind: input, shape index: {}]   ;;  %s1719_s8 = inlined_call_operand.vmem [shape: f32[16,1], index: 8, kind: input, shape index: {}]   ;;  %s1720_s9 = inlined_call_operand.vmem [shape: f32[16,1], index: 9, kind: input, shape index: {}]   ;;  %s1721_s10 = inlined_call_operand.vmem [shape: f32[16,16], index: 10, kind: input, shape index: {}]   ;;  %s1722_s13 = inlined_call_operand.vmem [shape: f32[8,1], index: 13, kind: input, shape index: {}]   ;;  %s1723_s12 = inlined_call_operand.vmem [shape: f32[64,8], index: 12, kind: input, shape index: {}]   ;;  %s1724_s11 = inlined_call_operand.vmem [shape: f32[64,8], index: 11, kind: input, shape index: {}]   ;;  %s1725_s15 = inlined_call_operand.vmem [shape: f32[8,1], index: 15, kind: input, shape index: {}]   ;;  %s1726_s14 = inlined_call_operand.vmem [shape: f32[8,1], index: 14, kind: input, shape index: {}]   ;;  %s1727_s16 = inlined_call_operand.vmem [shape: f32[8,2], index: 16, kind: output, shape index: {}]  }
   0x1   :  { %1729 = sst [smem:[#allocation4_spill]] %s1711_s0  ;;  %1179 = vset.pattern.permute.xlu1 %v1187_v2  ;;  %1180 = vset.pattern.permute.xlu0 %v1187_v2  ;;  %s1190_s17 = smov 126   ;;  %v147_v11 = vld [vmem:[%s1712_s2 + $0x18] sm:$0xff]  ;;  %v145_v13 = vld [vmem:[%s1712_s2 + $0x8] sm:$0xff]  ;;  %v146_v14 = vld [vmem:[%s1712_s2 + $0x10] sm:$0xff]  ;;  %vm87_vm2 = vcmask 1022976  }
   0x2   :  { %s1730_s23 = sld [smem:[#allocation4_spill]]  ;;  %s1191_s18 = smov 124   ;;  %vm1304_vm0 = vcmp.lt.s32.totalorder %v54_v5, 144  ;;  %245 = vmatprep.mubr.f32.mxu0 %v1194_v12  ;;  %454 = vmatprep.mubr.f32.mxu1 %v1194_v12  ;;  %v144_v15 = vld [vmem:[%s1712_s2] sm:$0xff]  ;;  %v300_v17 = vld [vmem:[%s1713_s4 + $0x10] sm:$0xff]  ;;  %v299_v18 = vld [vmem:[%s1713_s4 + $0x8] sm:$0xff] }
   0x3   :  { %s1192_s28 = smov 123   ;;  %s1193_s29 = smov 122   ;;  %v298_v16 = vld [vmem:[%s1713_s4] sm:$0xff]  ;;  %v324_v19 = vshrl.u32 %v54_v5, 7  ;;  %v301_v20 = vld [vmem:[%s1713_s4 + $0x18] sm:$0xff]  ;;  %vm76_vm3 = vcmask 1031168  }
   0x4   :  { %s1195_s21 = smov 121   ;;  %vm98_vm4 = vcmask 1014784   ;;  %vm109_vm5 = vcmask 1006592   ;;  %vm120_vm6 = vcmask 998400   ;;  %vm131_vm7 = vcmask 990208   ;;  %v140_v50 = vld [vmem:[%s1714_s1] sm:$0xff] }
   0x5   :  { %v325_v22 = vsub.s32 0, %v324_v19  ;;  %v329_v23 = vsub.s32 1, %v324_v19  ;;  %vm168_vm8 = vcmask 64512   ;;  %v141_v53 = vld [vmem:[%s1714_s1 + $0x8] sm:$0xff]  ;;  %v142_v58 = vld [vmem:[%s1714_s1 + $0x10] sm:$0xff]  ;;  %v143_v63 = vld [vmem:[%s1714_s1 + $0x18] sm:$0xff] }
   0x6   :  { %v678_v5 = vld [vmem:[%s1715_s7] sm:$0xff]  ;;  %v511_v8 = vld [vmem:[%s1716_s6 + $0x70] sm:$0xff] }
   0x8   :  { %v60_v0 = vld [vmem:[%s1730_s23] sm:$0x3] }
   0x9   :  { %v82_v1 = vld [vmem:[%s1730_s23] sm:$0x3]  ;;  %62 = vrot.lane.b32.xlu0 %v60_v0, %s1188_s26 }
   0xa   :  { %84 = vrot.lane.b32.xlu1 %v82_v1, %s1189_s27  ;;  %v71_v3 = vld [vmem:[%s1730_s23] sm:$0x3] }
   0xb   :  { %v93_v4 = vld [vmem:[%s1730_s23] sm:$0x3] }
   0xc   :  { %v104_v6 = vld [vmem:[%s1730_s23] sm:$0x3] }
   0xd   :  { %73 = vrot.lane.b32.xlu0 %v71_v3, %s1190_s17  ;;  %v115_v7 = vld [vmem:[%s1730_s23] sm:$0x3] }
   0xe   :  { %95 = vrot.lane.b32.xlu1 %v93_v4, %s1191_s18  ;;  %v53_v9 = vld [vmem:[%s1730_s23] sm:$0x3] }
   0xf   :  { %58 = vst.msk [vmem:[#allocation2] ss:$8 sm:$0x3] %vm1304_vm0, %v53_v9  ;;  %v126_v10 = vld [vmem:[%s1730_s23] sm:$0x3]  ;;  %v510_v9 = vld [vmem:[%s1716_s6 + $0x68] sm:$0xff] }
  0x10   :  { %v139_v21 = vld [vmem:[%s1730_s23] sm:$0x3] }
  0x11   :  { %106 = vrot.lane.b32.xlu0 %v104_v6, %s1192_s28  ;;  %v1345_v24 = vrot.slane %v139_v21, %v325_v22  ;;  %v1347_v25 = vrot.slane %v139_v21, %v329_v23  ;;  %v679_v6 = vld [vmem:[%s1715_s7 + $0x8] sm:$0xff] }
  0x12   :  { %117 = vrot.lane.b32.xlu1 %v115_v7, %s1193_s29  ;;  %v512_v7 = vld [vmem:[%s1716_s6 + $0x78] sm:$0xff] }
  0x15   :  { %128 = vrot.lane.b32.xlu0 %v126_v10, %s1195_s21  ;;  %v509_v10 = vld [vmem:[%s1716_s6 + $0x60] sm:$0xff] }
  0x16   :  { %165 = vperm.xlu1 %1179, %v147_v11   ;;  %v508_v11 = vld [vmem:[%s1716_s6 + $0x58] sm:$0xff] }
  0x19   :  { %160 = vperm.xlu0 %1180, %v146_v14   ;;  %v506_v14 = vld [vmem:[%s1716_s6 + $0x48] sm:$0xff] }
  0x1a   :  { %155 = vperm.xlu1 %1179, %v145_v13   ;;  %v507_v13 = vld [vmem:[%s1716_s6 + $0x50] sm:$0xff] }
  0x1d   :  { %304 = vperm.xlu0 %1180, %v298_v16   ;;  %v504_v16 = vld [vmem:[%s1716_s6 + $0x38] sm:$0xff] }
  0x1e   :  { %150 = vperm.xlu1 %1179, %v144_v15   ;;  %v505_v15 = vld [vmem:[%s1716_s6 + $0x40] sm:$0xff] }
  0x21   :  { %309 = vperm.xlu0 %1180, %v299_v18   ;;  %v502_v18 = vld [vmem:[%s1716_s6 + $0x28] sm:$0xff] }
  0x22   :  { %314 = vperm.xlu1 %1179, %v300_v17   ;;  %v503_v17 = vld [vmem:[%s1716_s6 + $0x30] sm:$0xff] }
  0x26   :  { %319 = vperm.xlu1 %1179, %v301_v20  }
  0x7b   :  { %v63_v26 = vpop.permute.xlu0 %62 }
  0x7c   :  { %v85_v27 = vpop.permute.xlu1 %84  ;;  %v64_v28 = vrot.slane %v63_v26, 1 }
  0x7d   :  { %v86_v29 = vrot.slane %v85_v27, 1 }
  0x7e   :  { %v66_v30 = vsel %vm65_vm1, %v63_v26, %v64_v28  ;;  %vm377_vm1 = vcmask 261120  }
  0x7f   :  { %v88_v31 = vsel %vm87_vm2, %v85_v27, %v86_v29  ;;  %69 = vst.msk [vmem:[#allocation2 + $0x1] ss:$8 sm:$0x3] %vm1304_vm0, %v66_v30  ;;  %v74_v32 = vpop.permute.xlu0 %73  ;;  %vm515_vm2 = vcmask 130048  }
  0x80   :  { %91 = vst.msk [vmem:[#allocation2 + $0x3] ss:$8 sm:$0x3] %vm1304_vm0, %v88_v31  ;;  %v96_v33 = vpop.permute.xlu1 %95  ;;  %v75_v34 = vrot.slane %v74_v32, 1 }
  0x81   :  { %v97_v35 = vrot.slane %v96_v33, 1 }
  0x82   :  { %v77_v36 = vsel %vm76_vm3, %v74_v32, %v75_v34  ;;  %vm692_vm3 = vcmask 523264  }
  0x83   :  { %v99_v37 = vsel %vm98_vm4, %v96_v33, %v97_v35  ;;  %80 = vst.msk [vmem:[#allocation2 + $0x2] ss:$8 sm:$0x3] %vm1304_vm0, %v77_v36  ;;  %v107_v38 = vpop.permute.xlu0 %106 }
  0x84   :  { %102 = vst.msk [vmem:[#allocation2 + $0x4] ss:$8 sm:$0x3] %vm1304_vm0, %v99_v37  ;;  %v118_v39 = vpop.permute.xlu1 %117  ;;  %v108_v40 = vrot.slane %v107_v38, 1 }
  0x85   :  { %v119_v41 = vrot.slane %v118_v39, 1 }
  0x86   :  { %v110_v42 = vsel %vm109_vm5, %v107_v38, %v108_v40 }
  0x87   :  { %v121_v43 = vsel %vm120_vm6, %v118_v39, %v119_v41  ;;  %113 = vst.msk [vmem:[#allocation2 + $0x5] ss:$8 sm:$0x3] %vm1304_vm0, %v110_v42  ;;  %v129_v44 = vpop.permute.xlu0 %128 }
  0x88   :  { %124 = vst.msk [vmem:[#allocation2 + $0x6] ss:$8 sm:$0x3] %vm1304_vm0, %v121_v43  ;;  %v130_v45 = vrot.slane %v129_v44, 1 }
  0x8a   :  { %v132_v46 = vsel %vm131_vm7, %v129_v44, %v130_v45  ;;  %vm1196_vm7 = vmmov 0  }
  0x8b   :  { %135 = vst.msk [vmem:[#allocation2 + $0x7] ss:$8 sm:$0x3] %vm1304_vm0, %v132_v46 }
  0x91   :  { %v1364_v47 = vpop.permute.xlu1 %165 }
  0x92   :  { %v138_v48 = vld [vmem:[#allocation2 + $0x8] sm:$0xff]  ;;  %v137_v49 = vld [vmem:[#allocation2] sm:$0xff] }
  0x93   :  { %211 = vmatprep.subr.mxu0 %v138_v48 }
  0x94   :  { %212 = vmatpush1.msra.mxu0 %v137_v49  ;;  %v1371_v52 = vpop.permute.xlu0 %160 }
  0x95   :  { %v1369_v51 = vpop.permute.xlu1 %155  ;;  %1086 = vmatmul.mubr.msk.f32.vlgmr.msra.gmra.mxu0 %vm168_vm8, %v140_v50  ;;  %522 = vmatprep.subr.mxu0 %v1194_v12  ;;  %v294_v50 = vld [vmem:[%s1717_s3] sm:$0xff] }
  0x96   :  { %251 = vmatprep.mubr.f32.mxu0 %v1194_v12  ;;  %523 = vmatpush1.msra.mxu0 %v512_v7  ;;  %v479_v7 = vld [vmem:[%s1718_s5] sm:$0xff] }
  0x97   :  { %524 = vmatprep.subr.mxu0 %v1194_v12 }
  0x98   :  { %v305_v55 = vpop.permute.xlu0 %304  ;;  %525 = vmatpush1.msra.mxu0 %v511_v8  ;;  %v500_v8 = vld [vmem:[%s1716_s6 + $0x18] sm:$0xff] }
  0x99   :  { %v1379_v54 = vpop.permute.xlu1 %150  ;;  %1087 = vmatmul.mubr.msk.f32.gmra.mxu0 %vm168_vm8, %v141_v53  ;;  %v333_v56 = vmul.f32 %v1345_v24, %v305_v55  ;;  %v334_v57 = vmul.f32 %v1347_v25, %v305_v55  ;;  %526 = vmatprep.subr.mxu0 %v1194_v12  ;;  %v493_v53 = vld [vmem:[%s1718_s5 + $0x70] sm:$0xff]  ;;  %v492_v55 = vld [vmem:[%s1718_s5 + $0x68] sm:$0xff] }
  0x9a   :  { %257 = vmatprep.mubr.f32.mxu0 %v1194_v12  ;;  %527 = vmatpush1.msra.mxu0 %v510_v9  ;;  %v496_v9 = vld [vmem:[%s1718_s5 + $0x88] sm:$0xff] }
  0x9b   :  { %351 = vrot.lane.b32.xlu1 %v334_v57, %s1191_s18  ;;  %349 = vrot.lane.b32.xlu0 %v333_v56, %s1191_s18  ;;  %v491_v56 = vld [vmem:[%s1718_s5 + $0x60] sm:$0xff]  ;;  %v296_v57 = vld [vmem:[%s1717_s3 + $0x10] sm:$0xff] }
  0x9c   :  { %v310_v60 = vpop.permute.xlu0 %309  ;;  %528 = vmatprep.subr.mxu0 %v1194_v12 }
  0x9d   :  { %v315_v59 = vpop.permute.xlu1 %314  ;;  %1088 = vmatmul.mubr.msk.f32.gmra.mxu0 %vm168_vm8, %v142_v58  ;;  %v335_v0 = vmul.f32 %v1345_v24, %v310_v60  ;;  %v336_v1 = vmul.f32 %v1347_v25, %v310_v60  ;;  %v490_v58 = vld [vmem:[%s1718_s5 + $0x58] sm:$0xff] }
  0x9e   :  { %v337_v61 = vmul.f32 %v1345_v24, %v315_v59  ;;  %v338_v62 = vmul.f32 %v1347_v25, %v315_v59  ;;  %263 = vmatprep.mubr.f32.mxu0 %v1194_v12  ;;  %529 = vmatpush1.msra.mxu0 %v509_v10  ;;  %v489_v59 = vld [vmem:[%s1718_s5 + $0x50] sm:$0xff]  ;;  %v297_v60 = vld [vmem:[%s1717_s3 + $0x18] sm:$0xff] }
  0x9f   :  { %530 = vmatprep.subr.mxu0 %v1194_v12  ;;  %v499_v10 = vld [vmem:[%s1716_s6 + $0x10] sm:$0xff] }
  0xa0   :  { %359 = vrot.lane.b32.xlu1 %v338_v62, %s1191_s18  ;;  %357 = vrot.lane.b32.xlu0 %v337_v61, %s1191_s18  ;;  %v488_v61 = vld [vmem:[%s1718_s5 + $0x48] sm:$0xff]  ;;  %v487_v62 = vld [vmem:[%s1718_s5 + $0x40] sm:$0xff] }
  0xa1   :  { %v320_v2 = vpop.permute.xlu1 %319  ;;  %1089 = vmatmul.mubr.msk.f32.gmra.mxu0 %vm168_vm8, %v143_v63  ;;  %v486_v63 = vld [vmem:[%s1718_s5 + $0x38] sm:$0xff] }
  0xa2   :  { %v339_v3 = vmul.f32 %v1345_v24, %v320_v2  ;;  %v340_v4 = vmul.f32 %v1347_v25, %v320_v2  ;;  %531 = vmatpush1.msra.mxu0 %v508_v11  ;;  %v483_v2 = vld [vmem:[%s1718_s5 + $0x20] sm:$0xff] }
  0xa3   :  { %532 = vmatprep.subr.mxu0 %v1194_v12  ;;  %v495_v11 = vld [vmem:[%s1718_s5 + $0x80] sm:$0xff] }
  0xa4   :  { %355 = vrot.lane.b32.xlu1 %v336_v1, %s1191_s18  ;;  %353 = vrot.lane.b32.xlu0 %v335_v0, %s1191_s18  ;;  %v485_v0 = vld [vmem:[%s1718_s5 + $0x30] sm:$0xff]  ;;  %v484_v1 = vld [vmem:[%s1718_s5 + $0x28] sm:$0xff] }
  0xa5   :  { %533 = vmatpush1.msra.mxu0 %v507_v13  ;;  %v498_v13 = vld [vmem:[%s1716_s6 + $0x8] sm:$0xff] }
  0xa6   :  { %534 = vmatprep.subr.mxu0 %v1194_v12 }
  0xa7   :  { %535 = vmatpush1.msra.mxu0 %v506_v14  ;;  %v497_v14 = vld [vmem:[%s1716_s6] sm:$0xff] }
  0xa8   :  { %363 = vrot.lane.b32.xlu1 %v340_v4, %s1191_s18  ;;  %361 = vrot.lane.b32.xlu0 %v339_v3, %s1191_s18  ;;  %v482_v3 = vld [vmem:[%s1718_s5 + $0x18] sm:$0xff]  ;;  %v481_v4 = vld [vmem:[%s1718_s5 + $0x10] sm:$0xff] }
  0xa9   :  { %536 = vmatprep.subr.mxu0 %v1194_v12 }
  0xaa   :  { %537 = vmatpush1.msra.mxu0 %v505_v15  ;;  %v514_v15 = vld [vmem:[%s1716_s6 + $0x88] sm:$0xff] }
  0xab   :  { %538 = vmatprep.subr.mxu0 %v1194_v12 }
  0xac   :  { %682 = vperm.xlu1 %1179, %v678_v5   ;;  %687 = vperm.xlu0 %1180, %v679_v6   ;;  %v480_v5 = vld [vmem:[%s1718_s5 + $0x8] sm:$0xff]  ;;  %v501_v6 = vld [vmem:[%s1716_s6 + $0x20] sm:$0xff] }
  0xad   :  { %539 = vmatpush1.msra.mxu0 %v504_v16  ;;  %v513_v16 = vld [vmem:[%s1716_s6 + $0x80] sm:$0xff] }
  0xae   :  { %540 = vmatprep.subr.mxu0 %v1194_v12 }
  0xaf   :  { %541 = vmatpush1.msra.mxu0 %v503_v17 }
  0xb0   :  { %542 = vmatprep.subr.mxu0 %v1194_v12 }
  0xb1   :  { %543 = vmatpush1.msra.mxu0 %v502_v18 }
  0xb2   :  { %544 = vmatprep.subr.mxu0 %v1194_v12 }
  0xb3   :  { %545 = vmatpush1.msra.mxu0 %v501_v6 }
  0xb4   :  { %546 = vmatprep.subr.mxu0 %v1194_v12 }
  0xb5   :  { %547 = vmatpush1.msra.mxu0 %v500_v8 }
  0xb6   :  { %548 = vmatprep.subr.mxu0 %v1194_v12 }
  0xb7   :  { %549 = vmatpush1.msra.mxu0 %v499_v10  ;;  %v720_v10 = vld [vmem:[%s1719_s8] sm:$0xff] }
  0xb8   :  { %550 = vmatprep.subr.mxu0 %v1194_v12 }
  0xb9   :  { %551 = vmatpush1.msra.mxu0 %v498_v13 }
  0xba   :  { %552 = vmatprep.subr.mxu0 %v1194_v12 }
  0xbb   :  { %553 = vmatpush1.msra.mxu0 %v497_v14 }
  0xbc   :  { %582 = vmatprep.subr.mxu0 %v1194_v12 }
  0xbd   :  { %583 = vmatpush2.msra.mxu0 %v514_v15 }
  0xbe   :  { %584 = vmatprep.subr.mxu0 %v1194_v12 }
  0xbf   :  { %585 = vmatpush2.msra.mxu0 %v513_v16 }
 0x10d   :  { %v352_v17 = vpop.permute.xlu1 %351  ;;  %v350_v18 = vpop.permute.xlu0 %349 }
 0x155   :  { %v247_v19 = vpop.f32.mrf.mxu0 }
 0x156   :  { %v248_v37 = vadd.f32 %v247_v19, %v1379_v54  ;;  %v360_v19 = vpop.permute.xlu1 %359 }
 0x157   :  { %v249_v20 = vpop.f32.mrf.mxu0 }
 0x158   :  { %v250_v32 = vadd.f32 %v249_v20, %v1379_v54  ;;  %v278_v45 = vmul.f32 0.01, %v248_v37  ;;  %vm270_vm0 = vcmp.gt.f32.partialorder %v248_v37, 0.0  ;;  %v295_v54 = vld [vmem:[%s1717_s3 + $0x8] sm:$0xff]  ;;  %v358_v20 = vpop.permute.xlu0 %357 }
 0x159   :  { %v253_v21 = vpop.f32.mrf.mxu0 }
 0x15a   :  { %v254_v33 = vadd.f32 %v253_v21, %v1369_v51  ;;  %v279_v43 = vmul.f32 0.01, %v250_v32  ;;  %vm271_vm15 = vcmp.gt.f32.partialorder %v250_v32, 0.0 }
 0x15b   :  { %v255_v22 = vpop.f32.mrf.mxu0 }
 0x15c   :  { %v256_v30 = vadd.f32 %v255_v22, %v1369_v51  ;;  %v280_v41 = vmul.f32 0.01, %v254_v33  ;;  %vm272_vm14 = vcmp.gt.f32.partialorder %v254_v33, 0.0  ;;  %v287_v49 = vsel %vm271_vm15, %v250_v32, %v279_v43 }
 0x15d   :  { %v259_v23 = vpop.f32.mrf.mxu0  ;;  %v286_v51 = vsel %vm270_vm0, %v248_v37, %v278_v45 }
 0x15e   :  { %v260_v28 = vadd.f32 %v259_v23, %v1371_v52  ;;  %v281_v39 = vmul.f32 0.01, %v256_v30  ;;  %vm273_vm13 = vcmp.gt.f32.partialorder %v256_v30, 0.0  ;;  %v288_v48 = vsel %vm272_vm14, %v254_v33, %v280_v41 }
 0x15f   :  { %v261_v24 = vpop.f32.mrf.mxu0  ;;  %v365_v23 = vsel %vm98_vm4, %v350_v18, %v352_v17 }
 0x160   :  { %v262_v26 = vadd.f32 %v261_v24, %v1371_v52  ;;  %v282_v38 = vmul.f32 0.01, %v260_v28  ;;  %vm274_vm12 = vcmp.gt.f32.partialorder %v260_v28, 0.0  ;;  %v494_v52 = vld [vmem:[%s1718_s5 + $0x78] sm:$0xff] }
 0x161   :  { %v265_v25 = vpop.f32.mrf.mxu0 }
 0x162   :  { %v266_v27 = vadd.f32 %v265_v25, %v1364_v47  ;;  %v283_v35 = vmul.f32 0.01, %v262_v26  ;;  %vm275_vm11 = vcmp.gt.f32.partialorder %v262_v26, 0.0  ;;  %v290_v46 = vsel %vm274_vm12, %v260_v28, %v282_v38  ;;  %v354_v28 = vpop.permute.xlu0 %353 }
 0x163   :  { %v267_v29 = vpop.f32.mrf.mxu0  ;;  %vm1080_vm12 = vcmask 15368  }
 0x164   :  { %v268_v31 = vadd.f32 %v267_v29, %v1364_v47  ;;  %v284_v34 = vmul.f32 0.01, %v266_v27  ;;  %vm276_vm10 = vcmp.gt.f32.partialorder %v266_v27, 0.0  ;;  %v291_v44 = vsel %vm275_vm11, %v262_v26, %v283_v35 }
 0x165   :  { %v289_v47 = vsel %vm273_vm13, %v256_v30, %v281_v39  ;;  %v367_v35 = vsel %vm98_vm4, %v358_v20, %v360_v19  ;;  %vm1074_vm11 = vcmask 7168  }
 0x166   :  { %vm277_vm9 = vcmp.gt.f32.partialorder %v268_v31, 0.0  ;;  %v285_v36 = vmul.f32 0.01, %v268_v31  ;;  %v292_v42 = vsel %vm276_vm10, %v266_v27, %v284_v34  ;;  %v356_v27 = vpop.permute.xlu1 %355  ;;  %vm1076_vm10 = vcmask 64544  }
 0x167   :  { %v366_v30 = vsel %vm98_vm4, %v354_v28, %v356_v27 }
 0x168   :  { %v293_v40 = vsel %vm277_vm9, %v268_v31, %v285_v36 }
 0x169   :  { %414 = vmatprep.subr.mxu1 %v293_v40  ;;  %v362_v40 = vpop.permute.xlu0 %361 }
 0x16a   :  { %415 = vmatpush1.msra.mxu1 %v292_v42  ;;  %v364_v39 = vpop.permute.xlu1 %363 }
 0x16b   :  { %416 = vmatprep.subr.mxu1 %v291_v44  ;;  %v368_v42 = vsel %vm98_vm4, %v362_v40, %v364_v39  ;;  %vm754_vm4 = vcmask 556544   ;;  %v883_v40 = vld [vmem:[%s1723_s12 + $0x28] sm:$0xff] }
 0x16c   :  { %417 = vmatpush1.msra.mxu1 %v290_v46  ;;  %755 = vst.msk [vmem:[#allocation3] sm:$0xff] %vm754_vm4, %v1194_v12  ;;  %756 = vst.msk [vmem:[#allocation3 + $0x8] sm:$0xff] %vm754_vm4, %v1194_v12 }
 0x16d   :  { %418 = vmatprep.subr.mxu1 %v289_v47 }
 0x16e   :  { %419 = vmatpush1.msra.mxu1 %v288_v48 }
 0x16f   :  { %420 = vmatprep.subr.mxu1 %v287_v49 }
 0x170   :  { %421 = vmatpush1.msra.mxu1 %v286_v51  ;;  %v683_v51 = vpop.permute.xlu1 %682 }
 0x171   :  { %1090 = vmatmul.mubr.msk.f32.vlgmr.msra.gmra.mxu1 %vm377_vm1, %v294_v50  ;;  %603 = vmatprep.subr.mxu1 %v1194_v12 }
 0x172   :  { %460 = vmatprep.mubr.f32.mxu1 %v1194_v12  ;;  %604 = vmatpush1.msra.mxu1 %v494_v52 }
 0x173   :  { %605 = vmatprep.subr.mxu1 %v1194_v12 }
 0x174   :  { %606 = vmatpush1.msra.mxu1 %v493_v53 }
 0x175   :  { %1091 = vmatmul.mubr.msk.f32.gmra.mxu1 %vm377_vm1, %v295_v54  ;;  %607 = vmatprep.subr.mxu1 %v1194_v12 }
 0x176   :  { %466 = vmatprep.mubr.f32.mxu1 %v1194_v12  ;;  %608 = vmatpush1.msra.mxu1 %v492_v55 }
 0x177   :  { %609 = vmatprep.subr.mxu1 %v1194_v12 }
 0x178   :  { %610 = vmatpush1.msra.mxu1 %v491_v56 }
 0x179   :  { %1092 = vmatmul.mubr.msk.f32.gmra.mxu1 %vm377_vm1, %v296_v57  ;;  %611 = vmatprep.subr.mxu1 %v1194_v12  ;;  %v688_v57 = vpop.permute.xlu0 %687 }
 0x17a   :  { %472 = vmatprep.mubr.f32.mxu1 %v1194_v12  ;;  %612 = vmatpush1.msra.mxu1 %v490_v58 }
 0x17b   :  { %613 = vmatprep.subr.mxu1 %v1194_v12 }
 0x17c   :  { %614 = vmatpush1.msra.mxu1 %v489_v59 }
 0x17d   :  { %1093 = vmatmul.mubr.msk.f32.gmra.mxu1 %vm377_vm1, %v297_v60  ;;  %615 = vmatprep.subr.mxu1 %v1194_v12 }
 0x17e   :  { %616 = vmatpush1.msra.mxu1 %v488_v61  ;;  %v721_v61 = vld [vmem:[%s1719_s8 + $0x8] sm:$0xff] }
 0x17f   :  { %617 = vmatprep.subr.mxu1 %v1194_v12 }
 0x180   :  { %618 = vmatpush1.msra.mxu1 %v487_v62  ;;  %v735_v62 = vld [vmem:[%s1720_s9 + $0x8] sm:$0xff] }
 0x181   :  { %619 = vmatprep.subr.mxu1 %v1194_v12 }
 0x182   :  { %620 = vmatpush1.msra.mxu1 %v486_v63  ;;  %v734_v63 = vld [vmem:[%s1720_s9] sm:$0xff] }
 0x183   :  { %621 = vmatprep.subr.mxu1 %v1194_v12 }
 0x184   :  { %622 = vmatpush1.msra.mxu1 %v485_v0 }
 0x185   :  { %623 = vmatprep.subr.mxu1 %v1194_v12 }
 0x186   :  { %624 = vmatpush1.msra.mxu1 %v484_v1 }
 0x187   :  { %625 = vmatprep.subr.mxu1 %v1194_v12 }
 0x188   :  { %626 = vmatpush1.msra.mxu1 %v483_v2 }
 0x189   :  { %627 = vmatprep.subr.mxu1 %v1194_v12 }
 0x18a   :  { %628 = vmatpush1.msra.mxu1 %v482_v3 }
 0x18b   :  { %629 = vmatprep.subr.mxu1 %v1194_v12 }
 0x18c   :  { %630 = vmatpush1.msra.mxu1 %v481_v4 }
 0x18d   :  { %631 = vmatprep.subr.mxu1 %v1194_v12 }
 0x18e   :  { %632 = vmatpush1.msra.mxu1 %v480_v5 }
 0x18f   :  { %633 = vmatprep.subr.mxu1 %v1194_v12 }
 0x190   :  { %634 = vmatpush1.msra.mxu1 %v479_v7 }
 0x191   :  { %663 = vmatprep.subr.mxu1 %v1194_v12 }
 0x192   :  { %664 = vmatpush2.msra.mxu1 %v496_v9 }
 0x193   :  { %665 = vmatprep.subr.mxu1 %v1194_v12 }
 0x194   :  { %666 = vmatpush2.msra.mxu1 %v495_v11 }
 0x195   :  { %1131 = vmatprep.subr.mxu1 %v1194_v12 }
 0x231   :  { %v456_v21 = vpop.f32.mrf.mxu1 }
 0x232   :  { %v457_v25 = vadd.f32 %v456_v21, %v365_v23 }
 0x233   :  { %v458_v22 = vpop.f32.mrf.mxu1 }
 0x234   :  { %v459_v24 = vadd.f32 %v458_v22, %v352_v17 }
 0x235   :  { %v462_v26 = vpop.f32.mrf.mxu1 }
 0x236   :  { %1096 = vmatprep.mubr.msk.f32.mxu1 %vm515_vm2, %v459_v24  ;;  %v463_v32 = vadd.f32 %v462_v26, %v366_v30 }
 0x237   :  { %v464_v29 = vpop.f32.mrf.mxu1  ;;  %668 = vmatmul.mubr.f32.vlgmr.msra.gmra.mxu1 %v457_v25 }
 0x238   :  { %v465_v31 = vadd.f32 %v464_v29, %v356_v27 }
 0x239   :  { %v468_v33 = vpop.f32.mrf.mxu1 }
 0x23a   :  { %1097 = vmatprep.mubr.msk.f32.mxu1 %vm515_vm2, %v465_v31  ;;  %v469_v37 = vadd.f32 %v468_v33, %v367_v35 }
 0x23b   :  { %v470_v34 = vpop.f32.mrf.mxu1  ;;  %673 = vmatmul.mubr.f32.gmra.mxu1 %v463_v32 }
 0x23c   :  { %v471_v36 = vadd.f32 %v470_v34, %v360_v19  ;;  %1147 = vmatprep.mubr.msk.f32.mxu1 %vm1196_vm7, %v1194_v12 }
 0x23d   :  { %v474_v38 = vpop.f32.mrf.mxu1 }
 0x23e   :  { %1094 = vmatprep.mubr.msk.f32.mxu0 %vm515_vm2, %v471_v36  ;;  %v475_v44 = vadd.f32 %v474_v38, %v368_v42  ;;  %v787_v36 = vld [vmem:[%s1721_s10] sm:$0xff]  ;;  %v884_v38 = vld [vmem:[%s1723_s12 + $0x30] sm:$0xff]  ;;  %v881_v42 = vld [vmem:[%s1723_s12 + $0x18] sm:$0xff] }
 0x23f   :  { %v476_v41 = vpop.f32.mrf.mxu1  ;;  %587 = vmatmul.mubr.f32.vlgmr.msra.gmra.mxu0 %v469_v37  ;;  %v885_v37 = vld [vmem:[%s1723_s12 + $0x38] sm:$0xff] }
 0x240   :  { %v477_v43 = vadd.f32 %v476_v41, %v364_v39  ;;  %v1032_v39 = vld [vmem:[%s1722_s13] sm:$0xff]  ;;  %1132 = vmatpush3.msra.mxu1 %v885_v37 }
 0x241   :  { %1133 = vmatprep.subr.mxu1 %v1194_v12  ;;  %v882_v41 = vld [vmem:[%s1723_s12 + $0x20] sm:$0xff] }
 0x242   :  { %1095 = vmatprep.mubr.msk.f32.mxu0 %vm515_vm2, %v477_v43  ;;  %1134 = vmatpush3.msra.mxu1 %v884_v38  ;;  %v880_v43 = vld [vmem:[%s1723_s12 + $0x10] sm:$0xff] }
 0x243   :  { %592 = vmatmul.mubr.f32.gmra.mxu0 %v475_v44  ;;  %1135 = vmatprep.subr.mxu1 %v1194_v12 }
 0x244   :  { %1128 = vmatprep.mubr.msk.f32.mxu0 %vm515_vm2, %v787_v36  ;;  %1136 = vmatpush3.msra.mxu1 %v883_v40 }
 0x245   :  { %1137 = vmatprep.subr.mxu1 %v1194_v12 }
 0x246   :  { %1138 = vmatpush3.msra.mxu1 %v882_v41 }
 0x247   :  { %1139 = vmatprep.subr.mxu1 %v1194_v12 }
 0x248   :  { %1140 = vmatpush3.msra.mxu1 %v881_v42 }
 0x249   :  { %1141 = vmatprep.subr.mxu1 %v1194_v12 }
 0x24a   :  { %1142 = vmatpush3.msra.mxu1 %v880_v43 }
 0x24b   :  { %1143 = vmatprep.subr.mxu1 %v1194_v12 }
 0x2f7   :  { %v669_v45 = vpop.f32.mrf.mxu1 }
 0x2f9   :  { %v671_v46 = vpop.f32.mrf.mxu1 }
 0x2fb   :  { %v674_v47 = vpop.f32.mrf.mxu1 }
 0x2fd   :  { %v676_v48 = vpop.f32.mrf.mxu1 }
 0x2ff   :  { %v588_v49 = vpop.f32.mrf.mxu0 }
 0x300   :  { %v670_v50 = vadd.f32 %v669_v45, %v588_v49 }
 0x301   :  { %v590_v52 = vpop.f32.mrf.mxu0 }
 0x302   :  { %v690_v53 = vadd.f32 %v683_v51, %v670_v50 }
 0x303   :  { %v593_v54 = vpop.f32.mrf.mxu0 }
 0x304   :  { %v675_v55 = vadd.f32 %v674_v47, %v593_v54  ;;  %v693_v56 = vsel %vm692_vm3, %v690_v53, 0.0 }
 0x305   :  { %v595_v58 = vpop.f32.mrf.mxu0  ;;  %694 = vadd.xlane.f32.xlu1 %v693_v56  ;;  %v788_v56 = vld [vmem:[%s1721_s10 + $0x8] sm:$0xff] }
 0x306   :  { %v691_v59 = vadd.f32 %v688_v57, %v675_v55  ;;  %v877_v57 = vld [vmem:[%s1724_s11 + $0x38] sm:$0xff]  ;;  %v876_v58 = vld [vmem:[%s1724_s11 + $0x30] sm:$0xff] }
 0x308   :  { %v696_v60 = vsel %vm692_vm3, %v691_v59, 0.0 }
 0x309   :  { %697 = vadd.xlane.f32.xlu0 %v696_v60  ;;  %v874_v60 = vld [vmem:[%s1724_s11 + $0x20] sm:$0xff] }
 0x316   :  { %729 = vperm.xlu1 %1179, %v721_v61   ;;  %v873_v61 = vld [vmem:[%s1724_s11 + $0x18] sm:$0xff] }
 0x31a   :  { %743 = vperm.xlu1 %1179, %v735_v62   ;;  %v872_v62 = vld [vmem:[%s1724_s11 + $0x10] sm:$0xff] }
 0x31e   :  { %738 = vperm.xlu1 %1179, %v734_v63   ;;  %v879_v63 = vld [vmem:[%s1723_s12 + $0x8] sm:$0xff] }
 0x31f   :  { %1144 = vmatpush3.msra.mxu1 %v879_v63 }
 0x320   :  { %1145 = vmatprep.subr.mxu1 %v1194_v12 }
 0x38e   :  { %v695_v0 = vpop.xlane.xlu1 %694 }
 0x38f   :  { %v700_v1 = vmul.f32 0.015625, %v695_v0  ;;  %v871_v0 = vld [vmem:[%s1724_s11 + $0x8] sm:$0xff] }
 0x391   :  { %v702_v2 = vsub.f32 %v690_v53, %v700_v1  ;;  %v878_v1 = vld [vmem:[%s1723_s12] sm:$0xff] }
 0x392   :  { %v698_v3 = vpop.xlane.xlu0 %697  ;;  %v730_v18 = vpop.permute.xlu1 %729  ;;  %1146 = vmatpush3.msra.mxu1 %v878_v1 }
 0x393   :  { %v701_v4 = vmul.f32 0.015625, %v698_v3  ;;  %v704_v5 = vmul.f32 %v702_v2, %v702_v2 }
 0x395   :  { %v703_v6 = vsub.f32 %v691_v59, %v701_v4  ;;  %v706_v7 = vsel %vm692_vm3, %v704_v5, 0.0  ;;  %v875_v59 = vld [vmem:[%s1724_s11 + $0x28] sm:$0xff] }
 0x396   :  { %707 = vadd.xlane.f32.xlu0 %v706_v7  ;;  %v744_v19 = vpop.permute.xlu1 %743 }
 0x397   :  { %v705_v8 = vmul.f32 %v703_v6, %v703_v6 }
 0x399   :  { %v709_v9 = vsel %vm692_vm3, %v705_v8, 0.0 }
 0x39a   :  { %710 = vadd.xlane.f32.xlu0 %v709_v9  ;;  %v739_v25 = vpop.permute.xlu1 %738 }
 0x3b0   :  { %724 = vperm.xlu0 %1180, %v720_v10  }
 0x41f   :  { %v708_v11 = vpop.xlane.xlu0 %707 }
 0x420   :  { %v712_v13 = vmul.f32 0.015625, %v708_v11 }
 0x422   :  { %v714_v14 = vadd.f32 1e-05, %v712_v13 }
 0x423   :  { %v711_v15 = vpop.xlane.xlu0 %710 }
 0x424   :  { %1181 = vrsqrt.f32 %v714_v14  ;;  %v713_v16 = vmul.f32 0.015625, %v711_v15 }
 0x426   :  { %v715_v17 = vadd.f32 1e-05, %v713_v16 }
 0x428   :  { %1183 = vrsqrt.f32 %v715_v17 }
 0x42b   :  { %v725_v22 = vpop.permute.xlu0 %724 }
 0x431   :  { %v1182_v20 = vpop.eup %1181 }
 0x432   :  { %v718_v21 = vmul.f32 %v1182_v20, %v702_v2  ;;  %v870_v2 = vld [vmem:[%s1724_s11] sm:$0xff] }
 0x434   :  { %v732_v23 = vmul.f32 %v725_v22, %v718_v21 }
 0x435   :  { %v1184_v24 = vpop.eup %1183 }
 0x436   :  { %v719_v26 = vmul.f32 %v1184_v24, %v703_v6  ;;  %v746_v27 = vadd.f32 %v739_v25, %v732_v23 }
 0x438   :  { %v733_v28 = vmul.f32 %v730_v18, %v719_v26  ;;  %vm748_vm5 = vcmp.gt.f32.partialorder %v746_v27, 0.0  ;;  %v750_v29 = vmul.f32 0.01, %v746_v27 }
 0x43a   :  { %v747_v30 = vadd.f32 %v744_v19, %v733_v28  ;;  %v752_v31 = vsel %vm748_vm5, %v746_v27, %v750_v29  ;;  %v1053_v19 = vld [vmem:[%s1726_s14] sm:$0xff] }
 0x43b   :  { %757 = vst.msk [vmem:[#allocation3] sm:$0xff] %vm692_vm3, %v752_v31 }
 0x43c   :  { %vm749_vm6 = vcmp.gt.f32.partialorder %v747_v30, 0.0  ;;  %v751_v32 = vmul.f32 0.01, %v747_v30 }
 0x43e   :  { %v753_v33 = vsel %vm749_vm6, %v747_v30, %v751_v32 }
 0x43f   :  { %758 = vst.msk [vmem:[#allocation3 + $0x8] sm:$0xff] %vm692_vm3, %v753_v33 }
 0x442   :  { %v759_v34 = vld [vmem:[#allocation3] sm:$0xff] }
 0x443   :  { %763 = vrot.lane.b32.xlu1 %v759_v34, %s1188_s26 }
 0x446   :  { %v760_v35 = vld [vmem:[#allocation3 + $0x8] sm:$0xff] }
 0x447   :  { %765 = vrot.lane.b32.xlu0 %v760_v35, %s1188_s26  ;;  %771 = vrot.lane.b32.xlu1 %v759_v34, %s1190_s17 }
 0x44b   :  { %773 = vrot.lane.b32.xlu0 %v760_v35, %s1190_s17  ;;  %779 = vrot.lane.b32.xlu1 %v759_v34, %s1189_s27 }
 0x44f   :  { %781 = vrot.lane.b32.xlu0 %v760_v35, %s1189_s27 }
 0x453   :  { %1035 = vperm.xlu0 %1180, %v1032_v39  }
 0x4b5   :  { %v764_v44 = vpop.permute.xlu1 %763 }
 0x4b6   :  { %v769_v49 = vmax.f32 %v752_v31, %v764_v44 }
 0x4b9   :  { %v766_v45 = vpop.permute.xlu0 %765  ;;  %v772_v46 = vpop.permute.xlu1 %771 }
 0x4ba   :  { %v770_v48 = vmax.f32 %v753_v33, %v766_v45  ;;  %v777_v53 = vmax.f32 %v769_v49, %v772_v46 }
 0x4bd   :  { %v774_v47 = vpop.permute.xlu0 %773  ;;  %v780_v51 = vpop.permute.xlu1 %779 }
 0x4be   :  { %v778_v50 = vmax.f32 %v770_v48, %v774_v47  ;;  %v785_v55 = vmax.f32 %v777_v53, %v780_v51 }
 0x4c1   :  { %v782_v52 = vpop.permute.xlu0 %781 }
 0x4c2   :  { %v786_v54 = vmax.f32 %v778_v50, %v782_v52 }
 0x4c4   :  { %1124 = vmatprep.subr.mxu0 %v786_v54 }
 0x4c5   :  { %1125 = vmatpush3.msra.mxu0 %v786_v54 }
 0x4c6   :  { %1126 = vmatprep.subr.mxu0 %v785_v55 }
 0x4c7   :  { %1127 = vmatpush3.msra.mxu0 %v785_v55 }
 0x4c8   :  { %1129 = vmatmul.mubr.msk.f32.vlgmr.msra.gmra.mxu0 %vm515_vm2, %v788_v56  ;;  %1150 = vmatprep.subr.mxu0 %v1194_v12 }
 0x4c9   :  { %1151 = vmatpush3.msra.mxu0 %v877_v57  ;;  %1166 = vmatprep.mubr.msk.f32.mxu0 %vm1196_vm7, %v1194_v12 }
 0x4ca   :  { %1152 = vmatprep.subr.mxu0 %v1194_v12 }
 0x4cb   :  { %1153 = vmatpush3.msra.mxu0 %v876_v58 }
 0x4cc   :  { %1154 = vmatprep.subr.mxu0 %v1194_v12 }
 0x4cd   :  { %1155 = vmatpush3.msra.mxu0 %v875_v59 }
 0x4ce   :  { %1156 = vmatprep.subr.mxu0 %v1194_v12  ;;  %v1036_v9 = vpop.permute.xlu0 %1035 }
 0x4cf   :  { %1157 = vmatpush3.msra.mxu0 %v874_v60 }
 0x4d0   :  { %1158 = vmatprep.subr.mxu0 %v1194_v12 }
 0x4d1   :  { %1159 = vmatpush3.msra.mxu0 %v873_v61 }
 0x4d2   :  { %1160 = vmatprep.subr.mxu0 %v1194_v12 }
 0x4d3   :  { %1161 = vmatpush3.msra.mxu0 %v872_v62 }
 0x4d4   :  { %1162 = vmatprep.subr.mxu0 %v1194_v12 }
 0x4d5   :  { %1163 = vmatpush3.msra.mxu0 %v871_v0 }
 0x4d6   :  { %1164 = vmatprep.subr.mxu0 %v1194_v12  ;;  %v1060_v12 = vld [vmem:[%s1725_s15] sm:$0xff] }
 0x4d7   :  { %1165 = vmatpush3.msra.mxu0 %v870_v2 }
 0x588   :  { %v1130_v3 = vpop.f32.mrf.mxu0 }
 0x589   :  { %1148 = vmatmul.mubr.msk.f32.vlgmr.msra.gmra.mxu1 %vm692_vm3, %v1130_v3 }
 0x58a   :  { %v861_v4 = vpop.f32.mrf.mxu0 }
 0x58b   :  { %1167 = vmatmul.mubr.msk.f32.vlgmr.msra.gmra.mxu0 %vm692_vm3, %v861_v4 }
 0x649   :  { %v955_v5 = vpop.f32.mrf.mxu1 }
 0x64b   :  { %v1028_v6 = vpop.f32.mrf.mxu0  ;;  %v1149_v7 = vpop.f32.mrf.mxu1 }
 0x64c   :  { %v1029_v8 = vadd.f32 %v1028_v6, %v955_v5 }
 0x64d   :  { %v1168_v10 = vpop.f32.mrf.mxu0 }
 0x64e   :  { %v1038_v11 = vadd.f32 %v1036_v9, %v1029_v8 }
 0x650   :  { %v1039_v13 = vsel %vm168_vm8, %v1038_v11, 0.0 }
 0x651   :  { %1040 = vadd.xlane.f32.xlu1 %v1039_v13 }
 0x662   :  { %1063 = vperm.xlu1 %1179, %v1060_v12  }
 0x6da   :  { %v1041_v14 = vpop.xlane.xlu1 %1040 }
 0x6db   :  { %v1043_v15 = vmul.f32 0.125, %v1041_v14 }
 0x6dd   :  { %v1044_v16 = vsub.f32 %v1038_v11, %v1043_v15 }
 0x6de   :  { %v1064_v27 = vpop.permute.xlu1 %1063 }
 0x6df   :  { %v1045_v17 = vmul.f32 %v1044_v16, %v1044_v16 }
 0x6e1   :  { %v1046_v18 = vsel %vm168_vm8, %v1045_v17, 0.0  ;;  %vm1070_vm8 = vcmask 31744  }
 0x6e2   :  { %1047 = vadd.xlane.f32.xlu0 %v1046_v18 }
 0x6f8   :  { %1056 = vperm.xlu0 %1180, %v1053_v19  }
 0x76b   :  { %v1048_v20 = vpop.xlane.xlu0 %1047 }
 0x76c   :  { %v1049_v21 = vmul.f32 0.125, %v1048_v20 }
 0x76e   :  { %v1050_v22 = vadd.f32 1e-05, %v1049_v21 }
 0x770   :  { %1185 = vrsqrt.f32 %v1050_v22 }
 0x773   :  { %v1057_v25 = vpop.permute.xlu0 %1056 }
 0x77d   :  { %v1186_v23 = vpop.eup %1185 }
 0x77e   :  { %v1052_v24 = vmul.f32 %v1186_v23, %v1044_v16 }
 0x780   :  { %v1059_v26 = vmul.f32 %v1057_v25, %v1052_v24 }
 0x782   :  { %v1066_v28 = vadd.f32 %v1064_v27, %v1059_v26 }
 0x784   :  { %vm1067_vm9 = vcmp.gt.f32.partialorder %v1066_v28, 0.0  ;;  %v1068_v29 = vmul.f32 0.01, %v1066_v28 }
 0x786   :  { %v1069_v30 = vsel %vm1067_vm9, %v1066_v28, %v1068_v29 }
 0x787   :  { %v1077_v31 = vsel %vm1076_vm10, %v1069_v30, -inf  ;;  %v1071_v32 = vsel %vm1070_vm8, %v1069_v30, -inf }
 0x788   :  { %1078 = vmax.xlane.f32.xlu0 %v1077_v31  ;;  %1072 = vmax.xlane.f32.xlu1 %v1071_v32 }
 0x811   :  { %v1079_v33 = vpop.xlane.xlu0 %1078  ;;  %v1073_v34 = vpop.xlane.xlu1 %1072 }
 0x812   :  { %1075 = vst.msk [vmem:[%s1727_s16] sm:$0xff] %vm1074_vm11, %v1073_v34 }
 0x813   :  { %1081 = vst.msk [vmem:[%s1727_s16] sm:$0xff] %vm1080_vm12, %v1079_v33 }

</bundles_post_ra>
